<compile_context>
chip_gen: v6e
topology: v6e:2x2x1
jax: 0.10.0
libtpu: 0.0.40
codegen_flags: <defaults>
</compile_context>

<pallas_src>
from functools import partial

import jax
import jax.numpy as jnp
from jax.experimental import pallas as pl
from jax.experimental.pallas import tpu as pltpu


_BIG = 1e30          # "masked / already-taken" distance sentinel (assumes real d^2 << 1e30)
_EPS = 1e-16


def fp_module_kernel(pos_tgt_ref, t_sq_ref, batch_tgt_ref, x_skip_ref,
                     pos_src_t_ref, s_sq_ref, batch_src_ref, x_src_ref,
                     w1y_ref, w1s_ref, b1_ref, w2_ref, b2_ref,
                     out_ref, *, k):
    big = jnp.float32(_BIG)
    n_src = pos_src_t_ref.shape[1]

    # Squared pairwise distances: ||t||^2 + ||s||^2 - 2 t.s  (MXU matmul, no transposes).
    cross = jnp.dot(pos_tgt_ref[...], pos_src_t_ref[...],
                    preferred_element_type=jnp.float32)              # (TM, N_src)
    d2 = jnp.maximum(t_sq_ref[...] + s_sq_ref[...] - 2.0 * cross, 0.0)

    # Only same-batch neighbors are eligible (exact semantics kept).
    same_batch = batch_tgt_ref[...] == batch_src_ref[...]            # (TM, N_src)
    d2 = jnp.where(same_batch, d2, big)

    # Iterative k-argmin extraction with exact lowest-index tie-breaking
    # (matches lax.top_k / torch knn). col_idx is hoisted out of the loop.
    col_idx = jax.lax.broadcasted_iota(jnp.int32, d2.shape, 1)
    w = jnp.zeros_like(d2)
    d_work = d2
    for _ in range(k):                                               # k small & static
        dmin = jnp.min(d_work, axis=1, keepdims=True)                # (TM, 1)
        idx_min = jnp.min(jnp.where(d_work == dmin, col_idx, n_src),
                          axis=1, keepdims=True)                     # lowest tied index
        onehot = col_idx == idx_min                                  # exactly one per row
        wk = pl.reciprocal(jnp.maximum(dmin, _EPS), approx=True)     # EUP slot
        wk = jnp.where(dmin < big, wk, 0.0)                          # exhausted -> 0 weight
        w = w + jnp.where(onehot, wk, 0.0)
        d_work = jnp.where(onehot, big, d_work)

    # knn_interpolate: weighted average of source features (one MXU matmul, f32).
    numer = jnp.dot(w, x_src_ref[...], preferred_element_type=jnp.float32)
    denom = jnp.maximum(jnp.sum(w, axis=1, keepdims=True), _EPS)     # guard: no NaN rows
    y = numer * pl.reciprocal(denom, approx=True)                    # (TM, C_in)

    # self.nn: Lin -> ReLU -> Lin -> ReLU, bf16 operands / f32 accumulation,
    # concat folded into a split matmul.
    h1 = jnp.dot(y.astype(w1y_ref.dtype), w1y_ref[...],
                 preferred_element_type=jnp.float32)
    h1 = h1 + jnp.dot(x_skip_ref[...], w1s_ref[...],
                      preferred_element_type=jnp.float32)
    h1 = jnp.maximum(h1 + b1_ref[...], 0.0)
    h2 = jnp.dot(h1.astype(w2_ref.dtype), w2_ref[...],
                 preferred_element_type=jnp.float32) + b2_ref[...]
    out_ref[...] = jnp.maximum(h2, 0.0).astype(out_ref.dtype)


def _round_up(x, m):
    return (x + m - 1) // m * m


def _choose_tile_m(n_tgt, n_src, c_in, c_skip, h_pad, c_out_pad,
                   vmem_budget=48 * 1024 * 1024):
    """Pick TM so resident operands + double-buffered tiles + workspaces fit VMEM."""
    # Resident (single-buffered, constant index_map) operands.
    resident = (4 * n_src * (3 + 1 + 1)            # pos_src_t, s_sq, batch_src
                + 4 * n_src * c_in                 # x_src (f32)
                + 2 * (c_in + c_skip) * h_pad      # w1y / w1s (bf16)
                + 2 * h_pad * c_out_pad            # w2 (bf16)
                + 4 * (h_pad + c_out_pad))         # biases (f32)
    # Per target-row cost: double-buffered in/out tiles + ~6 live f32 (TM, N_src)
    # workspaces (cross, d2/d_work, w, masks/iota) + dense MLP intermediates.
    per_row = (2 * (4 * 3 + 4 + 4 + 2 * c_skip)
               + 2 * 4 * c_out_pad
               + 6 * 4 * n_src
               + 4 * (c_in + h_pad))
    avail = max(vmem_budget - resident, 1 << 20)
    tm = int(min(1024, max(16, avail // max(per_row, 1))))
    tm -= tm % 16                      # bf16 sublane packing
    return max(16, min(tm, _round_up(n_tgt, 16)))


def _tile_map(i):
    return (i, 0)


def _resident_map(i):
    return (0, 0)


def fp_module_forward(x, pos, batch, x_skip, pos_skip, batch_skip, params, *, k,
                      tile_m=None, feature_dtype=jnp.bfloat16):
    """Returns (features_out, pos_skip, batch_skip), mirroring FPModule.forward."""
    w1y, w1s, b1, w2, b2 = params
    n_src, c_in = x.shape
    n_tgt = pos_skip.shape[0]
    c_skip = x_skip.shape[1]
    hidden = w1y.shape[1]
    c_out = w2.shape[1]

    # --- Lane-dense MLP layout: zero-pad hidden / output channels to 128 multiples. ---
    h_pad = _round_up(hidden, 128)
    c_out_pad = _round_up(c_out, 128)
    w1y_p = jnp.zeros((c_in, h_pad), feature_dtype).at[:, :hidden].set(w1y.astype(feature_dtype))
    w1s_p = jnp.zeros((c_skip, h_pad), feature_dtype).at[:, :hidden].set(w1s.astype(feature_dtype))
    b1_p = jnp.zeros((1, h_pad), jnp.float32).at[:, :hidden].set(b1.reshape(1, -1).astype(jnp.float32))
    w2_p = jnp.zeros((h_pad, c_out_pad), feature_dtype).at[:hidden, :c_out].set(w2.astype(feature_dtype))
    b2_p = jnp.zeros((1, c_out_pad), jnp.float32).at[:, :c_out].set(b2.reshape(1, -1).astype(jnp.float32))

    # --- Tile the target-point dimension; pad rows with a sentinel batch id (-1). ---
    if tile_m is None:
        tile_m = _choose_tile_m(n_tgt, n_src, c_in, c_skip, h_pad, c_out_pad)
    n_pad = _round_up(max(n_tgt, tile_m), tile_m)
    pad = n_pad - n_tgt
    pos_tgt = jnp.pad(pos_skip.astype(jnp.float32), ((0, pad), (0, 0)))
    x_skip_p = jnp.pad(x_skip.astype(feature_dtype), ((0, pad), (0, 0)))
    batch_tgt = jnp.pad(batch_skip.astype(jnp.int32), (0, pad),
                        constant_values=-1).reshape(-1, 1)

    # --- Pre-transpose source positions; precompute squared norms in the wrapper. ---
    pos_src = pos.astype(jnp.float32)
    pos_src_t = pos_src.T                                            # (3, N_src)
    t_sq = jnp.sum(pos_tgt * pos_tgt, axis=1, keepdims=True)         # (n_pad, 1)
    s_sq = jnp.sum(pos_src * pos_src, axis=1)[None, :]               # (1, N_src)
    batch_src = batch.astype(jnp.int32).reshape(1, -1)
    x_src = x.astype(jnp.float32)        # keep interpolation matmul in f32

    grid = (n_pad // tile_m,)
    in_specs = [
        pl.BlockSpec((tile_m, 3), _tile_map),            # pos_tgt
        pl.BlockSpec((tile_m, 1), _tile_map),            # t_sq
        pl.BlockSpec((tile_m, 1), _tile_map),            # batch_tgt
        pl.BlockSpec((tile_m, c_skip), _tile_map),       # x_skip
        pl.BlockSpec((3, n_src), _resident_map),         # pos_src_t   (resident)
        pl.BlockSpec((1, n_src), _resident_map),         # s_sq        (resident)
        pl.BlockSpec((1, n_src), _resident_map),         # batch_src   (resident)
        pl.BlockSpec((n_src, c_in), _resident_map),      # x_src       (resident)
        pl.BlockSpec((c_in, h_pad), _resident_map),      # w1y         (resident)
        pl.BlockSpec((c_skip, h_pad), _resident_map),    # w1s         (resident)
        pl.BlockSpec((1, h_pad), _resident_map),         # b1          (resident)
        pl.BlockSpec((h_pad, c_out_pad), _resident_map), # w2          (resident)
        pl.BlockSpec((1, c_out_pad), _resident_map),     # b2          (resident)
    ]
    out_specs = pl.BlockSpec((tile_m, c_out_pad), _tile_map)

    operands = (pos_tgt, t_sq, batch_tgt, x_skip_p, pos_src_t, s_sq, batch_src, x_src,
                w1y_p, w1s_p, b1_p, w2_p, b2_p)
    bytes_accessed = sum(int(a.size) * a.dtype.itemsize for a in operands)
    bytes_accessed += n_pad * c_out_pad * 4
    flops = (2 * n_pad * n_src * (3 + c_in)
             + 2 * n_pad * (c_in + c_skip) * h_pad
             + 2 * n_pad * h_pad * c_out_pad)

    out_padded = pl.pallas_call(
        partial(fp_module_kernel, k=k),
        out_shape=jax.ShapeDtypeStruct((n_pad, c_out_pad), jnp.float32),
        grid=grid,
        in_specs=in_specs,
        out_specs=out_specs,
        compiler_params=pltpu.CompilerParams(
            dimension_semantics=("parallel",),
            vmem_limit_bytes=48 * 1024 * 1024,
        ),
        cost_estimate=pl.CostEstimate(
            flops=int(flops),
            transcendentals=int(n_pad * (k + 1)),
            bytes_accessed=int(bytes_accessed),
        ),
    )(*operands)

    return out_padded[:n_tgt, :c_out], pos_skip, batch_skip


def ref_forward(x, pos, batch, x_skip, pos_skip, batch_skip, params, *, k):
    """Pure-JAX f32 reference with the same semantics (for correctness checking)."""
    w1y, w1s, b1, w2, b2 = params
    d2 = jnp.sum((pos_skip[:, None, :] - pos[None, :, :]) ** 2, axis=-1)
    d2 = jnp.where(batch_skip[:, None] == batch[None, :], d2, jnp.inf)
    neg_d, idx = jax.lax.top_k(-d2, k)
    dk = -neg_d
    wk = 1.0 / jnp.maximum(dk, 1e-16)
    feats = x[idx]                                                   # (N_tgt, k, C_in)
    y = jnp.sum(feats * wk[..., None], axis=1) / jnp.sum(wk, axis=1, keepdims=True)
    h1 = jnp.maximum(y @ w1y + x_skip @ w1s + b1, 0.0)
    h2 = jnp.maximum(h1 @ w2 + b2, 0.0)
    return h2


if __name__ == "__main__":
    key = jax.random.PRNGKey(0)
    ks = jax.random.split(key, 10)

    # Small shapes: 2 batches, coarse level has 8 points, fine (skip) level has 16.
    K = 3
    N_SRC, N_TGT = 8, 16
    C_IN, C_SKIP, HIDDEN, C_OUT = 32, 16, 32, 32

    x = jax.random.normal(ks[0], (N_SRC, C_IN), jnp.float32)
    pos = jax.random.normal(ks[1], (N_SRC, 3), jnp.float32)
    batch = jnp.concatenate([jnp.zeros(N_SRC // 2, jnp.int32),
                             jnp.ones(N_SRC // 2, jnp.int32)])
    x_skip = jax.random.normal(ks[2], (N_TGT, C_SKIP), jnp.float32)
    pos_skip = jax.random.normal(ks[3], (N_TGT, 3), jnp.float32)
    batch_skip = jnp.concatenate([jnp.zeros(N_TGT // 2, jnp.int32),
                                  jnp.ones(N_TGT // 2, jnp.int32)])

    # Deterministic MLP parameters (stored as (in, out), i.e. torch weight.T).
    w1y = jax.random.normal(ks[4], (C_IN, HIDDEN), jnp.float32) * 0.1
    w1s = jax.random.normal(ks[5], (C_SKIP, HIDDEN), jnp.float32) * 0.1
    b1 = jax.random.normal(ks[6], (1, HIDDEN), jnp.float32) * 0.1
    w2 = jax.random.normal(ks[7], (HIDDEN, C_OUT), jnp.float32) * 0.1
    b2 = jax.random.normal(ks[8], (1, C_OUT), jnp.float32) * 0.1
    params = (w1y, w1s, b1, w2, b2)

    out, pos_out, batch_out = fp_module_forward(
        x, pos, batch, x_skip, pos_skip, batch_skip, params, k=K)
    out = jax.block_until_ready(out)

    ref = ref_forward(x, pos, batch, x_skip, pos_skip, batch_skip, params, k=K)
    assert out.shape == (N_TGT, C_OUT)
    assert pos_out.shape == pos_skip.shape and batch_out.shape == batch_skip.shape
    # bf16 feature/weight path + approx reciprocals -> compare with a loose tolerance.
    assert jnp.allclose(out, ref, rtol=3e-2, atol=3e-2), "mismatch vs JAX reference"
    assert bool(jnp.all(jnp.isfinite(out))), "non-finite outputs"

    print("KERNEL_OK")
</pallas_src>

<mosaic_0001>
module attributes {stable_mosaic.version = 11 : i64} {
  func.func @fp_module_kernel(%arg0: i32, %arg1: memref<16x3xf32, #tpu.memory_space<vmem>>, %arg2: memref<16x1xf32, #tpu.memory_space<vmem>>, %arg3: memref<16x1xi32, #tpu.memory_space<vmem>>, %arg4: memref<16x16xbf16, #tpu.memory_space<vmem>>, %arg5: memref<3x8xf32, #tpu.memory_space<vmem>>, %arg6: memref<1x8xf32, #tpu.memory_space<vmem>>, %arg7: memref<1x8xi32, #tpu.memory_space<vmem>>, %arg8: memref<8x32xf32, #tpu.memory_space<vmem>>, %arg9: memref<32x128xbf16, #tpu.memory_space<vmem>>, %arg10: memref<16x128xbf16, #tpu.memory_space<vmem>>, %arg11: memref<1x128xf32, #tpu.memory_space<vmem>>, %arg12: memref<128x128xbf16, #tpu.memory_space<vmem>>, %arg13: memref<1x128xf32, #tpu.memory_space<vmem>>, %arg14: memref<16x128xf32, #tpu.memory_space<vmem>>) attributes {dimension_semantics = [#tpu.dimension_semantics<parallel>], iteration_bounds = array<i64: 1>, scalar_prefetch = 0 : i64, scratch_operands = 0 : i64, tpu.core_type = #tpu.core_type<tc>, window_params = [{transform_indices = @transform_0, window_bounds = array<i64: 16, 3>}, {transform_indices = @transform_1, window_bounds = array<i64: 16, 1>}, {transform_indices = @transform_2, window_bounds = array<i64: 16, 1>}, {transform_indices = @transform_3, window_bounds = array<i64: 16, 16>}, {pipeline_mode = #tpu.pipeline_mode<synchronous>, transform_indices = @transform_4, window_bounds = array<i64: 3, 8>}, {pipeline_mode = #tpu.pipeline_mode<synchronous>, transform_indices = @transform_5, window_bounds = array<i64: 1, 8>}, {pipeline_mode = #tpu.pipeline_mode<synchronous>, transform_indices = @transform_6, window_bounds = array<i64: 1, 8>}, {pipeline_mode = #tpu.pipeline_mode<synchronous>, transform_indices = @transform_7, window_bounds = array<i64: 8, 32>}, {pipeline_mode = #tpu.pipeline_mode<synchronous>, transform_indices = @transform_8, window_bounds = array<i64: 32, 128>}, {pipeline_mode = #tpu.pipeline_mode<synchronous>, transform_indices = @transform_9, window_bounds = array<i64: 16, 128>}, {pipeline_mode = #tpu.pipeline_mode<synchronous>, transform_indices = @transform_10, window_bounds = array<i64: 1, 128>}, {pipeline_mode = #tpu.pipeline_mode<synchronous>, transform_indices = @transform_11, window_bounds = array<i64: 128, 128>}, {pipeline_mode = #tpu.pipeline_mode<synchronous>, transform_indices = @transform_12, window_bounds = array<i64: 1, 128>}, {transform_indices = @transform_13, window_bounds = array<i64: 16, 128>}]} {
    %c0 = arith.constant 0 : index
    %c0_0 = arith.constant 0 : index
    %0 = vector.load %arg1[%c0, %c0_0] : memref<16x3xf32, #tpu.memory_space<vmem>>, vector<16x3xf32>
    %c0_1 = arith.constant 0 : index
    %c0_2 = arith.constant 0 : index
    %1 = vector.load %arg5[%c0_1, %c0_2] : memref<3x8xf32, #tpu.memory_space<vmem>>, vector<3x8xf32>
    %cst = arith.constant dense<0.000000e+00> : vector<16x8xf32>
    %2 = tpu.matmul %0, %1, %cst {dimension_numbers = #tpu.dot_dimension_numbers<[1], [0], [0], [1], [0, 0, 1, 1], [], []>} : vector<16x3xf32>, vector<3x8xf32>, vector<16x8xf32> -> vector<16x8xf32>
    %c0_3 = arith.constant 0 : index
    %c0_4 = arith.constant 0 : index
    %3 = vector.load %arg2[%c0_3, %c0_4] : memref<16x1xf32, #tpu.memory_space<vmem>>, vector<16x1xf32>
    %c0_5 = arith.constant 0 : index
    %c0_6 = arith.constant 0 : index
    %4 = vector.load %arg6[%c0_5, %c0_6] : memref<1x8xf32, #tpu.memory_space<vmem>>, vector<1x8xf32>
    %5 = vector.broadcast %3 : vector<16x1xf32> to vector<16x8xf32>
    %6 = vector.broadcast %4 : vector<1x8xf32> to vector<16x8xf32>
    %7 = arith.addf %5, %6 : vector<16x8xf32>
    %cst_7 = arith.constant 2.000000e+00 : f32
    %8 = vector.broadcast %cst_7 : f32 to vector<16x8xf32>
    %9 = arith.mulf %8, %2 : vector<16x8xf32>
    %10 = arith.subf %7, %9 : vector<16x8xf32>
    %cst_8 = arith.constant 0.000000e+00 : f32
    %11 = vector.broadcast %cst_8 : f32 to vector<16x8xf32>
    %12 = arith.maximumf %10, %11 : vector<16x8xf32>
    %c0_9 = arith.constant 0 : index
    %c0_10 = arith.constant 0 : index
    %13 = vector.load %arg3[%c0_9, %c0_10] : memref<16x1xi32, #tpu.memory_space<vmem>>, vector<16x1xi32>
    %c0_11 = arith.constant 0 : index
    %c0_12 = arith.constant 0 : index
    %14 = vector.load %arg7[%c0_11, %c0_12] : memref<1x8xi32, #tpu.memory_space<vmem>>, vector<1x8xi32>
    %15 = vector.broadcast %13 : vector<16x1xi32> to vector<16x8xi32>
    %16 = vector.broadcast %14 : vector<1x8xi32> to vector<16x8xi32>
    %17 = arith.cmpi eq, %15, %16 : vector<16x8xi32>
    %cst_13 = arith.constant 1.000000e+30 : f32
    %18 = vector.broadcast %cst_13 : f32 to vector<16x8xf32>
    %19 = arith.select %17, %12, %18 : vector<16x8xi1>, vector<16x8xf32>
    %20 = tpu.iota {dimensions = array<i32: 1>} : vector<16x8xi32>
    %cst_14 = arith.constant 0.000000e+00 : f32
    %21 = vector.broadcast %cst_14 : f32 to vector<16x8xf32>
    %cst_15 = arith.constant dense<0x7F800000> : vector<16xf32>
    %22 = vector.multi_reduction <minimumf>, %19, %cst_15 [1] : vector<16x8xf32> to vector<16xf32>
    %23 = vector.shape_cast %22 : vector<16xf32> to vector<16x1xf32>
    %24 = vector.broadcast %23 : vector<16x1xf32> to vector<16x8xf32>
    %25 = arith.cmpf oeq, %19, %24 : vector<16x8xf32>
    %c8_i32 = arith.constant 8 : i32
    %26 = vector.broadcast %c8_i32 : i32 to vector<16x8xi32>
    %27 = arith.select %25, %20, %26 : vector<16x8xi1>, vector<16x8xi32>
    %cst_16 = arith.constant dense<2147483647> : vector<16xi32>
    %28 = vector.multi_reduction <minsi>, %27, %cst_16 [1] : vector<16x8xi32> to vector<16xi32>
    %29 = vector.shape_cast %28 : vector<16xi32> to vector<16x1xi32>
    %30 = vector.broadcast %29 : vector<16x1xi32> to vector<16x8xi32>
    %31 = arith.cmpi eq, %20, %30 : vector<16x8xi32>
    %cst_17 = arith.constant 1.000000e-16 : f32
    %32 = vector.broadcast %cst_17 : f32 to vector<16x1xf32>
    %33 = arith.maximumf %23, %32 : vector<16x1xf32>
    %34 = tpu.reciprocal %33 {approx = true} : vector<16x1xf32> -> vector<16x1xf32>
    %cst_18 = arith.constant 1.000000e+30 : f32
    %35 = vector.broadcast %cst_18 : f32 to vector<16x1xf32>
    %36 = arith.cmpf olt, %23, %35 : vector<16x1xf32>
    %cst_19 = arith.constant 0.000000e+00 : f32
    %37 = vector.broadcast %cst_19 : f32 to vector<16x1xf32>
    %38 = arith.select %36, %34, %37 : vector<16x1xi1>, vector<16x1xf32>
    %cst_20 = arith.constant 0.000000e+00 : f32
    %39 = vector.shape_cast %38 : vector<16x1xf32> to vector<16x1xf32>
    %40 = vector.broadcast %39 : vector<16x1xf32> to vector<16x8xf32>
    %41 = vector.broadcast %cst_20 : f32 to vector<16x8xf32>
    %42 = arith.select %31, %40, %41 : vector<16x8xi1>, vector<16x8xf32>
    %43 = arith.addf %21, %42 : vector<16x8xf32>
    %cst_21 = arith.constant 1.000000e+30 : f32
    %44 = vector.broadcast %cst_21 : f32 to vector<16x8xf32>
    %45 = arith.select %31, %44, %19 : vector<16x8xi1>, vector<16x8xf32>
    %cst_22 = arith.constant dense<0x7F800000> : vector<16xf32>
    %46 = vector.multi_reduction <minimumf>, %45, %cst_22 [1] : vector<16x8xf32> to vector<16xf32>
    %47 = vector.shape_cast %46 : vector<16xf32> to vector<16x1xf32>
    %48 = vector.broadcast %47 : vector<16x1xf32> to vector<16x8xf32>
    %49 = arith.cmpf oeq, %45, %48 : vector<16x8xf32>
    %c8_i32_23 = arith.constant 8 : i32
    %50 = vector.broadcast %c8_i32_23 : i32 to vector<16x8xi32>
    %51 = arith.select %49, %20, %50 : vector<16x8xi1>, vector<16x8xi32>
    %cst_24 = arith.constant dense<2147483647> : vector<16xi32>
    %52 = vector.multi_reduction <minsi>, %51, %cst_24 [1] : vector<16x8xi32> to vector<16xi32>
    %53 = vector.shape_cast %52 : vector<16xi32> to vector<16x1xi32>
    %54 = vector.broadcast %53 : vector<16x1xi32> to vector<16x8xi32>
    %55 = arith.cmpi eq, %20, %54 : vector<16x8xi32>
    %cst_25 = arith.constant 1.000000e-16 : f32
    %56 = vector.broadcast %cst_25 : f32 to vector<16x1xf32>
    %57 = arith.maximumf %47, %56 : vector<16x1xf32>
    %58 = tpu.reciprocal %57 {approx = true} : vector<16x1xf32> -> vector<16x1xf32>
    %cst_26 = arith.constant 1.000000e+30 : f32
    %59 = vector.broadcast %cst_26 : f32 to vector<16x1xf32>
    %60 = arith.cmpf olt, %47, %59 : vector<16x1xf32>
    %cst_27 = arith.constant 0.000000e+00 : f32
    %61 = vector.broadcast %cst_27 : f32 to vector<16x1xf32>
    %62 = arith.select %60, %58, %61 : vector<16x1xi1>, vector<16x1xf32>
    %cst_28 = arith.constant 0.000000e+00 : f32
    %63 = vector.shape_cast %62 : vector<16x1xf32> to vector<16x1xf32>
    %64 = vector.broadcast %63 : vector<16x1xf32> to vector<16x8xf32>
    %65 = vector.broadcast %cst_28 : f32 to vector<16x8xf32>
    %66 = arith.select %55, %64, %65 : vector<16x8xi1>, vector<16x8xf32>
    %67 = arith.addf %43, %66 : vector<16x8xf32>
    %cst_29 = arith.constant 1.000000e+30 : f32
    %68 = vector.broadcast %cst_29 : f32 to vector<16x8xf32>
    %69 = arith.select %55, %68, %45 : vector<16x8xi1>, vector<16x8xf32>
    %cst_30 = arith.constant dense<0x7F800000> : vector<16xf32>
    %70 = vector.multi_reduction <minimumf>, %69, %cst_30 [1] : vector<16x8xf32> to vector<16xf32>
    %71 = vector.shape_cast %70 : vector<16xf32> to vector<16x1xf32>
    %72 = vector.broadcast %71 : vector<16x1xf32> to vector<16x8xf32>
    %73 = arith.cmpf oeq, %69, %72 : vector<16x8xf32>
    %c8_i32_31 = arith.constant 8 : i32
    %74 = vector.broadcast %c8_i32_31 : i32 to vector<16x8xi32>
    %75 = arith.select %73, %20, %74 : vector<16x8xi1>, vector<16x8xi32>
    %cst_32 = arith.constant dense<2147483647> : vector<16xi32>
    %76 = vector.multi_reduction <minsi>, %75, %cst_32 [1] : vector<16x8xi32> to vector<16xi32>
    %77 = vector.shape_cast %76 : vector<16xi32> to vector<16x1xi32>
    %78 = vector.broadcast %77 : vector<16x1xi32> to vector<16x8xi32>
    %79 = arith.cmpi eq, %20, %78 : vector<16x8xi32>
    %cst_33 = arith.constant 1.000000e-16 : f32
    %80 = vector.broadcast %cst_33 : f32 to vector<16x1xf32>
    %81 = arith.maximumf %71, %80 : vector<16x1xf32>
    %82 = tpu.reciprocal %81 {approx = true} : vector<16x1xf32> -> vector<16x1xf32>
    %cst_34 = arith.constant 1.000000e+30 : f32
    %83 = vector.broadcast %cst_34 : f32 to vector<16x1xf32>
    %84 = arith.cmpf olt, %71, %83 : vector<16x1xf32>
    %cst_35 = arith.constant 0.000000e+00 : f32
    %85 = vector.broadcast %cst_35 : f32 to vector<16x1xf32>
    %86 = arith.select %84, %82, %85 : vector<16x1xi1>, vector<16x1xf32>
    %cst_36 = arith.constant 0.000000e+00 : f32
    %87 = vector.shape_cast %86 : vector<16x1xf32> to vector<16x1xf32>
    %88 = vector.broadcast %87 : vector<16x1xf32> to vector<16x8xf32>
    %89 = vector.broadcast %cst_36 : f32 to vector<16x8xf32>
    %90 = arith.select %79, %88, %89 : vector<16x8xi1>, vector<16x8xf32>
    %91 = arith.addf %67, %90 : vector<16x8xf32>
    %c0_37 = arith.constant 0 : index
    %c0_38 = arith.constant 0 : index
    %92 = vector.load %arg8[%c0_37, %c0_38] : memref<8x32xf32, #tpu.memory_space<vmem>>, vector<8x32xf32>
    %cst_39 = arith.constant dense<0.000000e+00> : vector<16x32xf32>
    %93 = tpu.matmul %91, %92, %cst_39 {dimension_numbers = #tpu.dot_dimension_numbers<[1], [0], [0], [1], [0, 0, 1, 1], [], []>} : vector<16x8xf32>, vector<8x32xf32>, vector<16x32xf32> -> vector<16x32xf32>
    %cst_40 = arith.constant dense<0.000000e+00> : vector<16xf32>
    %94 = vector.multi_reduction <add>, %91, %cst_40 [1] : vector<16x8xf32> to vector<16xf32>
    %95 = vector.shape_cast %94 : vector<16xf32> to vector<16x1xf32>
    %cst_41 = arith.constant 1.000000e-16 : f32
    %96 = vector.broadcast %cst_41 : f32 to vector<16x1xf32>
    %97 = arith.maximumf %95, %96 : vector<16x1xf32>
    %98 = tpu.reciprocal %97 {approx = true} : vector<16x1xf32> -> vector<16x1xf32>
    %99 = vector.broadcast %98 : vector<16x1xf32> to vector<16x32xf32>
    %100 = arith.mulf %93, %99 : vector<16x32xf32>
    %101 = arith.truncf %100 : vector<16x32xf32> to vector<16x32xbf16>
    %c0_42 = arith.constant 0 : index
    %c0_43 = arith.constant 0 : index
    %102 = vector.load %arg9[%c0_42, %c0_43] : memref<32x128xbf16, #tpu.memory_space<vmem>>, vector<32x128xbf16>
    %cst_44 = arith.constant dense<0.000000e+00> : vector<16x128xf32>
    %103 = tpu.matmul %101, %102, %cst_44 {dimension_numbers = #tpu.dot_dimension_numbers<[1], [0], [0], [1], [0, 0, 1, 1], [], []>} : vector<16x32xbf16>, vector<32x128xbf16>, vector<16x128xf32> -> vector<16x128xf32>
    %c0_45 = arith.constant 0 : index
    %c0_46 = arith.constant 0 : index
    %104 = vector.load %arg4[%c0_45, %c0_46] : memref<16x16xbf16, #tpu.memory_space<vmem>>, vector<16x16xbf16>
    %c0_47 = arith.constant 0 : index
    %c0_48 = arith.constant 0 : index
    %105 = vector.load %arg10[%c0_47, %c0_48] : memref<16x128xbf16, #tpu.memory_space<vmem>>, vector<16x128xbf16>
    %cst_49 = arith.constant dense<0.000000e+00> : vector<16x128xf32>
    %106 = tpu.matmul %104, %105, %cst_49 {dimension_numbers = #tpu.dot_dimension_numbers<[1], [0], [0], [1], [0, 0, 1, 1], [], []>} : vector<16x16xbf16>, vector<16x128xbf16>, vector<16x128xf32> -> vector<16x128xf32>
    %107 = arith.addf %103, %106 : vector<16x128xf32>
    %c0_50 = arith.constant 0 : index
    %c0_51 = arith.constant 0 : index
    %108 = vector.load %arg11[%c0_50, %c0_51] : memref<1x128xf32, #tpu.memory_space<vmem>>, vector<1x128xf32>
    %109 = vector.broadcast %108 : vector<1x128xf32> to vector<16x128xf32>
    %110 = arith.addf %107, %109 : vector<16x128xf32>
    %cst_52 = arith.constant 0.000000e+00 : f32
    %111 = vector.broadcast %cst_52 : f32 to vector<16x128xf32>
    %112 = arith.maximumf %110, %111 : vector<16x128xf32>
    %113 = arith.truncf %112 : vector<16x128xf32> to vector<16x128xbf16>
    %c0_53 = arith.constant 0 : index
    %c0_54 = arith.constant 0 : index
    %114 = vector.load %arg12[%c0_53, %c0_54] : memref<128x128xbf16, #tpu.memory_space<vmem>>, vector<128x128xbf16>
    %cst_55 = arith.constant dense<0.000000e+00> : vector<16x128xf32>
    %115 = tpu.matmul %113, %114, %cst_55 {dimension_numbers = #tpu.dot_dimension_numbers<[1], [0], [0], [1], [0, 0, 1, 1], [], []>} : vector<16x128xbf16>, vector<128x128xbf16>, vector<16x128xf32> -> vector<16x128xf32>
    %c0_56 = arith.constant 0 : index
    %c0_57 = arith.constant 0 : index
    %116 = vector.load %arg13[%c0_56, %c0_57] : memref<1x128xf32, #tpu.memory_space<vmem>>, vector<1x128xf32>
    %117 = vector.broadcast %116 : vector<1x128xf32> to vector<16x128xf32>
    %118 = arith.addf %115, %117 : vector<16x128xf32>
    %cst_58 = arith.constant 0.000000e+00 : f32
    %119 = vector.broadcast %cst_58 : f32 to vector<16x128xf32>
    %120 = arith.maximumf %118, %119 : vector<16x128xf32>
    %c0_59 = arith.constant 0 : index
    %c0_60 = arith.constant 0 : index
    %121 = vector.load %arg14[%c0_59, %c0_60] : memref<16x128xf32, #tpu.memory_space<vmem>>, vector<16x128xf32>
    tpu.vector_store %arg14[%c0_59, %c0_60], %120 {strides = array<i32>} : memref<16x128xf32, #tpu.memory_space<vmem>>, vector<16x128xf32>,
    return
  }
  func.func @transform_0(%arg0: i32) -> (i32, i32) {
    %c0_i32 = arith.constant 0 : i32
    %c0_i32_0 = arith.constant 0 : i32
    return %arg0, %c0_i32 : i32, i32
  }
  func.func @transform_1(%arg0: i32) -> (i32, i32) {
    %c0_i32 = arith.constant 0 : i32
    %c0_i32_0 = arith.constant 0 : i32
    return %arg0, %c0_i32 : i32, i32
  }
  func.func @transform_2(%arg0: i32) -> (i32, i32) {
    %c0_i32 = arith.constant 0 : i32
    %c0_i32_0 = arith.constant 0 : i32
    return %arg0, %c0_i32 : i32, i32
  }
  func.func @transform_3(%arg0: i32) -> (i32, i32) {
    %c0_i32 = arith.constant 0 : i32
    %c0_i32_0 = arith.constant 0 : i32
    return %arg0, %c0_i32 : i32, i32
  }
  func.func @transform_4(%arg0: i32) -> (i32, i32) {
    %c0_i32 = arith.constant 0 : i32
    %c0_i32_0 = arith.constant 0 : i32
    %c0_i32_1 = arith.constant 0 : i32
    return %c0_i32, %c0_i32_0 : i32, i32
  }
  func.func @transform_5(%arg0: i32) -> (i32, i32) {
    %c0_i32 = arith.constant 0 : i32
    %c0_i32_0 = arith.constant 0 : i32
    %c0_i32_1 = arith.constant 0 : i32
    return %c0_i32, %c0_i32_0 : i32, i32
  }
  func.func @transform_6(%arg0: i32) -> (i32, i32) {
    %c0_i32 = arith.constant 0 : i32
    %c0_i32_0 = arith.constant 0 : i32
    %c0_i32_1 = arith.constant 0 : i32
    return %c0_i32, %c0_i32_0 : i32, i32
  }
  func.func @transform_7(%arg0: i32) -> (i32, i32) {
    %c0_i32 = arith.constant 0 : i32
    %c0_i32_0 = arith.constant 0 : i32
    %c0_i32_1 = arith.constant 0 : i32
    return %c0_i32, %c0_i32_0 : i32, i32
  }
  func.func @transform_8(%arg0: i32) -> (i32, i32) {
    %c0_i32 = arith.constant 0 : i32
    %c0_i32_0 = arith.constant 0 : i32
    %c0_i32_1 = arith.constant 0 : i32
    return %c0_i32, %c0_i32_0 : i32, i32
  }
  func.func @transform_9(%arg0: i32) -> (i32, i32) {
    %c0_i32 = arith.constant 0 : i32
    %c0_i32_0 = arith.constant 0 : i32
    %c0_i32_1 = arith.constant 0 : i32
    return %c0_i32, %c0_i32_0 : i32, i32
  }
  func.func @transform_10(%arg0: i32) -> (i32, i32) {
    %c0_i32 = arith.constant 0 : i32
    %c0_i32_0 = arith.constant 0 : i32
    %c0_i32_1 = arith.constant 0 : i32
    return %c0_i32, %c0_i32_0 : i32, i32
  }
  func.func @transform_11(%arg0: i32) -> (i32, i32) {
    %c0_i32 = arith.constant 0 : i32
    %c0_i32_0 = arith.constant 0 : i32
    %c0_i32_1 = arith.constant 0 : i32
    return %c0_i32, %c0_i32_0 : i32, i32
  }
  func.func @transform_12(%arg0: i32) -> (i32, i32) {
    %c0_i32 = arith.constant 0 : i32
    %c0_i32_0 = arith.constant 0 : i32
    %c0_i32_1 = arith.constant 0 : i32
    return %c0_i32, %c0_i32_0 : i32, i32
  }
  func.func @transform_13(%arg0: i32) -> (i32, i32) {
    %c0_i32 = arith.constant 0 : i32
    %c0_i32_0 = arith.constant 0 : i32
    return %arg0, %c0_i32 : i32, i32
  }
}

</mosaic_0001>

<bundles_post_ra>
// kernel: tpu_custom_call.1
= control target key start
LH: loop header
LB: loop body
LE: loop exit
PB: predicated region body
PF: predicated region fallthrough
CT: control target
= control target key end

     0   :  { %18 = vsyncpa [#allocation3], 0  ;;  %s1249_s0 = inlined_call_operand.vmem [shape: f32[16,3], index: 0, kind: input, shape index: {}]   ;;  %s1250_s1 = inlined_call_operand.vmem [shape: f32[16,1], index: 1, kind: input, shape index: {}]   ;;  %s1251_s2 = inlined_call_operand.vmem [shape: s32[16,1], index: 2, kind: input, shape index: {}]   ;;  %s1252_s3 = inlined_call_operand.vmem [shape: bf16[16,16], index: 3, kind: input, shape index: {}]   ;;  %s1253_s4 = inlined_call_operand.hbm [shape: f32[3,8], index: 4, kind: input, shape index: {}]   ;;  %s1254_s5 = inlined_call_operand.vmem [shape: f32[1,8], index: 5, kind: input, shape index: {}]   ;;  %s1255_s6 = inlined_call_operand.vmem [shape: s32[1,8], index: 6, kind: input, shape index: {}]   ;;  %s1256_s7 = inlined_call_operand.hbm [shape: f32[8,32], index: 7, kind: input, shape index: {}]   ;;  %s1257_s8 = inlined_call_operand.hbm [shape: bf16[32,128], index: 8, kind: input, shape index: {}]   ;;  %s1258_s9 = inlined_call_operand.hbm [shape: bf16[16,128], index: 9, kind: input, shape index: {}]   ;;  %s1259_s10 = inlined_call_operand.hbm [shape: f32[1,128], index: 10, kind: input, shape index: {}]   ;;  %s1260_s11 = inlined_call_operand.vmem [shape: bf16[128,128], index: 11, kind: input, shape index: {}]   ;;  %s1261_s12 = inlined_call_operand.vmem [shape: f32[1,128], index: 12, kind: input, shape index: {}]   ;;  %s1262_s13 = inlined_call_operand.hbm [shape: f32[16,128], index: 13, kind: output, shape index: {}]  }
   0x1   :  { %19 = vsyncpa [#allocation6], 0 }
   0x2   :  { %20 = vsyncpa [#allocation9], 0 }
   0x3   :  { %21 = vsyncpa [#allocation4], 0  ;;  %s1031_s25 = smov [#allocation5]  }
   0x4   :  { %s50_s26 = sshll.u32 %s1031_s25, 4  ;;  %s51_s26 = int_to_ptr.vmem [resolvable:$true] %s50_s26 }
   0x5   :  { %s911_s27 = scalar_lea.vmem %s51_s26, 128  ;;  %p916_p1 = scmp.lt.s32.totalorder %s51_s26, %s51_s26 }
   0x6   :  { %p912_p0 = scmp.ne.s32.totalorder %s51_s26, %s911_s27  ;;  %p917_p2 = scmp.lt.s32.totalorder %s911_s27, %s911_s27 }
   0x8   :  { %p918_p3 = por %p917_p2, %p916_p1 }
   0xa   :  { %p919_p4 = pnand %p918_p3, %p912_p0 }
   0xc   :  { %922 = shalt.err (!%p919_p4)
}
   0xd   :  { %53 = dma.hbm_to_vmem [thread:$0]  %s1256_s7, 128, %s51_s26, [#allocation6]  }
   0xe   :  { %s1032_s30 = smov [#allocation8]   ;;  %s1033_s15 = smov [#allocation2]  }
   0xf   :  { %s71_s14 = sshll.u32 %s1032_s30, 4  ;;  %s36_s16 = sshll.u32 %s1033_s15, 4  ;;  %s72_s14 = int_to_ptr.vmem [resolvable:$true] %s71_s14  ;;  %s37_s16 = int_to_ptr.vmem [resolvable:$true] %s36_s16 }
  0x10   :  { %s931_s17 = scalar_lea.vmem %s72_s14, 128  ;;  %p936_p6 = scmp.lt.s32.totalorder %s72_s14, %s72_s14 }
  0x11   :  { %p932_p5 = scmp.ne.s32.totalorder %s72_s14, %s931_s17  ;;  %p937_p7 = scmp.lt.s32.totalorder %s931_s17, %s931_s17 }
  0x13   :  { %p938_p8 = por %p937_p7, %p936_p6 }
  0x15   :  { %p939_p9 = pnand %p938_p8, %p932_p5 }
  0x17   :  { %942 = shalt.err (!%p939_p9)
}
  0x18   :  { %s1034_s18 = smov 64   ;;  %s1035_s19 = smov 4  }
  0x19   :  { %77 = dma.hbm_to_vmem [thread:$0]  %s1258_s9, 128, %s72_s14, [#allocation9], %s1034_s18, %s1034_s18, %s1035_s19  }
  0x1a   :  { %s951_s7 = scalar_lea.vmem %s37_s16, 64  ;;  %p956_p11 = scmp.lt.s32.totalorder %s37_s16, %s37_s16 }
  0x1b   :  { %p952_p10 = scmp.ne.s32.totalorder %s37_s16, %s951_s7  ;;  %p957_p12 = scmp.lt.s32.totalorder %s951_s7, %s951_s7 }
  0x1d   :  { %p958_p13 = por %p957_p12, %p956_p11 }
  0x1f   :  { %p959_p0 = pnand %p958_p13, %p952_p10 }
  0x21   :  { %962 = shalt.err (!%p959_p0)
}
  0x22   :  { %39 = dma.hbm_to_vmem [thread:$0]  %s1253_s4, 64, %s37_s16, [#allocation3]  }
  0x23   :  { %s1036_s24 = smov [#allocation7]   ;;  %s1037_s26 = smov [#allocation10]  }
  0x24   :  { %s59_s25 = sshll.u32 %s1036_s24, 4  ;;  %s84_s27 = sshll.u32 %s1037_s26, 4  ;;  %s60_s25 = int_to_ptr.vmem [resolvable:$true] %s59_s25  ;;  %s85_s27 = int_to_ptr.vmem [resolvable:$true] %s84_s27 }
  0x25   :  { %s971_s28 = scalar_lea.vmem %s60_s25, 256  ;;  %p976_p2 = scmp.lt.s32.totalorder %s60_s25, %s60_s25 }
  0x26   :  { %p972_p1 = scmp.ne.s32.totalorder %s60_s25, %s971_s28  ;;  %p977_p3 = scmp.lt.s32.totalorder %s971_s28, %s971_s28 }
  0x28   :  { %p978_p4 = por %p977_p3, %p976_p2 }
  0x2a   :  { %p979_p5 = pnand %p978_p4, %p972_p1 }
  0x2c   :  { %982 = shalt.err (!%p979_p5)
}
  0x2d   :  { %65 = dma.hbm_to_vmem [thread:$0]  %s1257_s8, 256, %s60_s25, [#allocation6], %s1034_s18, %s1034_s18, %s1035_s19  }
  0x2e   :  { %s991_s30 = scalar_lea.vmem %s85_s27, 16  ;;  %s995_s4 = scalar_lea.vmem %s85_s27, 32 }
  0x2f   :  { %p992_p6 = scmp.ne.s32.totalorder %s85_s27, %s991_s30  ;;  %p996_p7 = scmp.lt.s32.totalorder %s85_s27, %s85_s27 }
  0x30   :  { %p997_p8 = scmp.lt.s32.totalorder %s995_s4, %s991_s30 }
  0x32   :  { %p998_p9 = por %p997_p8, %p996_p7 }
  0x34   :  { %p999_p10 = pnand %p998_p9, %p992_p6 }
  0x36   :  { %1002 = shalt.err (!%p999_p10)
}
  0x37   :  { %87 = dma.hbm_to_vmem [thread:$0]  %s1259_s10, 16, %s85_s27, [#allocation9]  }
  0x38   :  { %1023 = dma.done.wait [#allocation3], 64  }
  0x39   :  { %1024 = vsyncadd [#allocation3], 4294967232 }
  0x3a   :  { %1025 = dma.done.wait [#allocation6], 384  }
  0x3b   :  { %1026 = vsyncadd [#allocation6], 4294966912 }
  0x3c   :  { %1027 = dma.done.wait [#allocation9], 144  }
  0x3d   :  { %1028 = vsyncadd [#allocation9], 4294967152  ;;  %v1038_v0 = vmov 0   ;;  %vm118_vm0 = vcmask 1042432   ;;  %vm111_vm1 = vcmask 23552   ;;  %v108_v2 = vld [vmem:[%s1249_s0] sm:$0xff]  ;;  %v241_v28 = vlaneseq }
  0x3e   :  { %873 = vset.pattern.permute.xlu0 %v1038_v0  ;;  %874 = vset.pattern.permute.xlu1 %v1038_v0  ;;  %v110_v1 = vld [vmem:[#allocation2] sm:$0x7]  ;;  %v109_v3 = vld [vmem:[%s1249_s0 + $0x8] sm:$0xff]  ;;  %vm243_vm3 = vcmask 64512  }
  0x3f   :  { %816 = vmatprep.subr.msk.mxu1 %vm118_vm0, %v110_v1  ;;  %818 = vmatprep.mubr.msk.f32.mxu1 %vm111_vm1, %v108_v2  ;;  %v197_v4 = vld [vmem:[%s1250_s1] sm:$0xff]  ;;  %v198_v6 = vld [vmem:[%s1250_s1 + $0x8] sm:$0xff]  ;;  %v1155_v29 = vand.u32 127, %v241_v28 }
  0x40   :  { %v224_v5 = vld [vmem:[%s1251_s2] sm:$0xff]  ;;  %817 = vmatpush3.msk.msra.mxu1 %vm118_vm0, %v110_v1  ;;  %202 = vperm.xlu0 %873, %v197_v4   ;;  %v225_v7 = vld [vmem:[%s1251_s2 + $0x8] sm:$0xff] }
  0x41   :  { %819 = vmatmul.mubr.msk.f32.vlgmr.msra.gmra.mxu1 %vm111_vm1, %v109_v3  ;;  %228 = vperm.xlu1 %874, %v224_v5   ;;  %v776_v10 = vld [vmem:[%s1254_s5] ss:$0 sm:$0xff] }
  0x42   :  { %v777_v16 = vld [vmem:[%s1255_s6] ss:$0 sm:$0xff] }
  0x44   :  { %207 = vperm.xlu0 %873, %v198_v6  }
  0x45   :  { %231 = vperm.xlu1 %874, %v225_v7  }
  0xbb   :  { %v203_v8 = vpop.permute.xlu0 %202 }
  0xbc   :  { %v229_v9 = vpop.permute.xlu1 %228  ;;  %v216_v14 = vadd.f32 %v776_v10, %v203_v8 }
  0xbd   :  { %vm237_vm4 = vcmp.eq.s32.totalorder %v229_v9, %v777_v16 }
  0xbf   :  { %v208_v11 = vpop.permute.xlu0 %207 }
  0xc0   :  { %v217_v12 = vadd.f32 %v776_v10, %v208_v11  ;;  %v232_v17 = vpop.permute.xlu1 %231 }
  0xc1   :  { %vm238_vm2 = vcmp.eq.s32.totalorder %v232_v17, %v777_v16 }
 0x101   :  { %v820_v13 = vpop.f32.mrf.mxu1 }
 0x102   :  { %v219_v15 = vmul.f32 2.0, %v820_v13 }
 0x103   :  { %v188_v18 = vpop.f32.mrf.mxu1 }
 0x104   :  { %v221_v19 = vsub.f32 %v217_v12, %v219_v15  ;;  %v218_v20 = vmul.f32 2.0, %v188_v18 }
 0x106   :  { %v223_v21 = vmax.f32 %v221_v19, 0.0  ;;  %v220_v22 = vsub.f32 %v216_v14, %v218_v20 }
 0x108   :  { %v222_v23 = vmax.f32 %v220_v22, 0.0  ;;  %v240_v24 = vsel %vm238_vm2, %v223_v21, 1e+30 }
 0x109   :  { %v247_v25 = vsel %vm243_vm3, %v240_v24, inf }
 0x10a   :  { %248 = vmin.xlane.f32.xlu1 %v247_v25  ;;  %v239_v26 = vsel %vm237_vm4, %v222_v23, 1e+30 }
 0x10b   :  { %v244_v27 = vsel %vm243_vm3, %v239_v26, inf }
 0x10c   :  { %245 = vmin.xlane.f32.xlu0 %v244_v27 }
 0x193   :  { %v1157_v30 = vpop.xlane.xlu1 %248 }
 0x194   :  { %vm251_vm5 = vcmp.eq.f32.partialorder %v240_v24, %v1157_v30  ;;  %v287_v18 = vmax.f32 %v1157_v30, 1e-16  ;;  %vm291_vm2 = vcmp.lt.f32.partialorder %v1157_v30, 1e+30 }
 0x195   :  { %v1160_v31 = vpop.xlane.xlu0 %245  ;;  %v253_v32 = vsel %vm251_vm5, %v1155_v29, 8 }
 0x196   :  { %vm250_vm6 = vcmp.eq.f32.partialorder %v239_v26, %v1160_v31  ;;  %v269_v35 = vsel %vm243_vm3, %v253_v32, 2147483647  ;;  %v286_v16 = vmax.f32 %v1160_v31, 1e-16  ;;  %vm290_vm15 = vcmp.lt.f32.partialorder %v1160_v31, 1e+30 }
 0x197   :  { %v252_v33 = vsel %vm250_vm6, %v1155_v29, 8  ;;  %v271_v38 = vshra.s32 %v269_v35, 16  ;;  %v270_v43 = vand.u32 65535, %v269_v35 }
 0x198   :  { %v254_v34 = vsel %vm243_vm3, %v252_v33, 2147483647  ;;  %887 = vrcp.f32 %v286_v16 }
 0x199   :  { %v256_v36 = vshra.s32 %v254_v34, 16  ;;  %v273_v39 = vcvt.s32.f32 %v271_v38  ;;  %v255_v40 = vand.u32 65535, %v254_v34  ;;  %v272_v46 = vcvt.s32.f32 %v270_v43 }
 0x19b   :  { %v258_v37 = vcvt.s32.f32 %v256_v36  ;;  %v257_v42 = vcvt.s32.f32 %v255_v40 }
 0x19d   :  { %259 = vmin.xlane.f32.xlu0 %v258_v37 }
 0x1a1   :  { %274 = vmin.xlane.f32.xlu0 %v273_v39 }
 0x1a5   :  { %v888_v22 = vpop.eup %887 }
 0x1a6   :  { %v292_v28 = vsel %vm290_vm15, %v888_v22, 0.0  ;;  %vm524_vm15 = vcmask 130048  }
 0x226   :  { %v260_v41 = vpop.xlane.xlu0 %259 }
 0x227   :  { %vm261_vm7 = vcmp.eq.f32.partialorder %v258_v37, %v260_v41  ;;  %v266_v48 = vcvt.f32.s32 %v260_v41 }
 0x228   :  { %v262_v44 = vsel %vm261_vm7, %v257_v42, inf }
 0x229   :  { %263 = vmin.xlane.f32.xlu1 %v262_v44  ;;  %v267_v50 = vshll.u32 %v266_v48, 16 }
 0x22a   :  { %v275_v45 = vpop.xlane.xlu0 %274 }
 0x22b   :  { %vm276_vm8 = vcmp.eq.f32.partialorder %v273_v39, %v275_v45  ;;  %v281_v51 = vcvt.f32.s32 %v275_v45 }
 0x22c   :  { %v277_v47 = vsel %vm276_vm8, %v272_v46, inf }
 0x22d   :  { %278 = vmin.xlane.f32.xlu0 %v277_v47  ;;  %v282_v55 = vshll.u32 %v281_v51, 16 }
 0x2b2   :  { %v264_v49 = vpop.xlane.xlu1 %263 }
 0x2b3   :  { %v265_v52 = vcvt.f32.s32 %v264_v49 }
 0x2b5   :  { %v1167_v53 = vadd.s32 %v267_v50, %v265_v52 }
 0x2b6   :  { %v279_v54 = vpop.xlane.xlu0 %278 }
 0x2b7   :  { %v280_v56 = vcvt.f32.s32 %v279_v54  ;;  %vm284_vm9 = vcmp.eq.s32.totalorder %v1155_v29, %v1167_v53 }
 0x2b8   :  { %v298_v57 = vsel %vm284_vm9, 1e+30, %v239_v26  ;;  %v294_v38 = vsel %vm284_vm9, %v292_v28, 0.0  ;;  %v877_v28 = vld [vmem:[#allocation7 + $0x8] sm:$0xff]  }
 0x2b9   :  { %v1174_v58 = vadd.s32 %v282_v55, %v280_v56  ;;  %v300_v59 = vsel %vm243_vm3, %v298_v57, inf }
 0x2ba   :  { %301 = vmin.xlane.f32.xlu1 %v300_v59 }
 0x2bb   :  { %vm285_vm10 = vcmp.eq.s32.totalorder %v1155_v29, %v1174_v58 }
 0x2bc   :  { %v1182_v60 = vsel %vm285_vm10, 1e+30, %v240_v24 }
 0x2bd   :  { %v303_v61 = vsel %vm243_vm3, %v1182_v60, inf }
 0x2be   :  { %304 = vmin.xlane.f32.xlu0 %v303_v61 }
 0x343   :  { %v302_v62 = vpop.xlane.xlu1 %301 }
 0x344   :  { %vm306_vm11 = vcmp.eq.f32.partialorder %v298_v57, %v302_v62  ;;  %v342_v17 = vmax.f32 %v302_v62, 1e-16  ;;  %vm346_vm0 = vcmp.lt.f32.partialorder %v302_v62, 1e+30 }
 0x345   :  { %v308_v63 = vsel %vm306_vm11, %v1155_v29, 8 }
 0x346   :  { %v310_v0 = vsel %vm243_vm3, %v308_v63, 2147483647  ;;  %889 = vrcp.f32 %v342_v17 }
 0x347   :  { %v305_v1 = vpop.xlane.xlu0 %304  ;;  %v312_v2 = vshra.s32 %v310_v0, 16  ;;  %v311_v8 = vand.u32 65535, %v310_v0  ;;  %891 = vrcp.f32 %v287_v18 }
 0x348   :  { %vm307_vm12 = vcmp.eq.f32.partialorder %v1182_v60, %v305_v1  ;;  %v343_v19 = vmax.f32 %v305_v1, 1e-16  ;;  %vm347_vm4 = vcmp.lt.f32.partialorder %v305_v1, 1e+30 }
 0x349   :  { %v314_v3 = vcvt.s32.f32 %v312_v2  ;;  %v309_v4 = vsel %vm307_vm12, %v1155_v29, 8  ;;  %v313_v10 = vcvt.s32.f32 %v311_v8 }
 0x34a   :  { %v325_v5 = vsel %vm243_vm3, %v309_v4, 2147483647  ;;  %893 = vrcp.f32 %v343_v19 }
 0x34b   :  { %315 = vmin.xlane.f32.xlu1 %v314_v3  ;;  %v327_v6 = vshra.s32 %v325_v5, 16  ;;  %v326_v11 = vand.u32 65535, %v325_v5 }
 0x34d   :  { %v329_v7 = vcvt.s32.f32 %v327_v6  ;;  %v328_v14 = vcvt.s32.f32 %v326_v11 }
 0x34f   :  { %330 = vmin.xlane.f32.xlu0 %v329_v7 }
 0x353   :  { %v890_v26 = vpop.eup %889 }
 0x354   :  { %v892_v33 = vpop.eup %891  ;;  %v348_v36 = vsel %vm346_vm0, %v890_v26, 0.0  ;;  %v875_v26 = vld [vmem:[#allocation8] sm:$0xff]  }
 0x355   :  { %v293_v43 = vsel %vm291_vm2, %v892_v33, 0.0  ;;  %v879_v33 = vld [vmem:[%s1260_s11 + $0x38] sm:$0xff]  }
 0x356   :  { %v295_v45 = vsel %vm285_vm10, %v293_v43, 0.0 }
 0x357   :  { %v894_v37 = vpop.eup %893 }
 0x358   :  { %v349_v44 = vsel %vm347_vm4, %v894_v37, 0.0  ;;  %v883_v37 = vld [vmem:[%s1260_s11 + $0x18] sm:$0xff]  }
 0x3d4   :  { %v316_v9 = vpop.xlane.xlu1 %315 }
 0x3d5   :  { %vm317_vm13 = vcmp.eq.f32.partialorder %v314_v3, %v316_v9  ;;  %v322_v20 = vcvt.f32.s32 %v316_v9  ;;  %v410_v3 = vld [vmem:[#allocation5] sm:$0xff] }
 0x3d6   :  { %v318_v12 = vsel %vm317_vm13, %v313_v10, inf  ;;  %821 = vmatprep.subr.mxu1 %v410_v3 }
 0x3d7   :  { %319 = vmin.xlane.f32.xlu1 %v318_v12  ;;  %v323_v23 = vshll.u32 %v322_v20, 16  ;;  %822 = vmatpush3.msra.mxu1 %v410_v3 }
 0x3d8   :  { %v331_v13 = vpop.xlane.xlu0 %330 }
 0x3d9   :  { %vm332_vm14 = vcmp.eq.f32.partialorder %v329_v7, %v331_v13  ;;  %v337_v24 = vcvt.f32.s32 %v331_v13 }
 0x3da   :  { %v333_v15 = vsel %vm332_vm14, %v328_v14, inf  ;;  %vm1040_vm14 = vmmov 0  }
 0x3db   :  { %334 = vmin.xlane.f32.xlu0 %v333_v15  ;;  %v338_v34 = vshll.u32 %v337_v24, 16 }
 0x460   :  { %v320_v21 = vpop.xlane.xlu1 %319 }
 0x461   :  { %v321_v25 = vcvt.f32.s32 %v320_v21 }
 0x463   :  { %v324_v27 = vadd.s32 %v323_v23, %v321_v25 }
 0x464   :  { %v335_v32 = vpop.xlane.xlu0 %334 }
 0x465   :  { %v336_v35 = vcvt.f32.s32 %v335_v32  ;;  %vm340_vm1 = vcmp.eq.s32.totalorder %v1155_v29, %v324_v27  ;;  %v1039_v27 = vmov 0.0   ;;  %v878_v32 = vld [vmem:[#allocation7] sm:$0xff]  }
 0x466   :  { %v354_v39 = vsel %vm340_vm1, 1e+30, %v298_v57  ;;  %v350_v40 = vsel %vm340_vm1, %v348_v36, 0.0  ;;  %826 = vmatprep.subr.bf16.mxu1 %v1039_v27  ;;  %840 = vmatprep.subr.bf16.mxu0 %v1039_v27  ;;  %v882_v36 = vld [vmem:[%s1260_s11 + $0x20] sm:$0xff]  }
 0x467   :  { %v339_v41 = vadd.s32 %v338_v34, %v336_v35  ;;  %v356_v31 = vsel %vm243_vm3, %v354_v39, inf  ;;  %v352_v42 = vadd.f32 %v350_v40, %v294_v38  ;;  %856 = vmatprep.mubr.msk.bf16.mxu0 %vm1040_vm14, %v1039_v27  ;;  %841 = vmatpush3.bf16.msra.mxu0 %v879_v33  ;;  %v880_v34 = vld [vmem:[%s1260_s11 + $0x30] sm:$0xff]   ;;  %v881_v35 = vld [vmem:[%s1260_s11 + $0x28] sm:$0xff]  }
 0x468   :  { %357 = vmin.xlane.f32.xlu1 %v356_v31  ;;  %842 = vmatprep.subr.bf16.mxu0 %v1039_v27 }
 0x469   :  { %vm341_vm5 = vcmp.eq.s32.totalorder %v1155_v29, %v339_v41 }
 0x46a   :  { %v355_v46 = vsel %vm341_vm5, 1e+30, %v1182_v60  ;;  %v351_v47 = vsel %vm341_vm5, %v349_v44, 0.0 }
 0x46b   :  { %v359_v48 = vsel %vm243_vm3, %v355_v46, inf  ;;  %v353_v49 = vadd.f32 %v351_v47, %v295_v45  ;;  %843 = vmatpush3.bf16.msra.mxu0 %v880_v34 }
 0x46c   :  { %360 = vmin.xlane.f32.xlu0 %v359_v48  ;;  %844 = vmatprep.subr.bf16.mxu0 %v1039_v27 }
 0x46f   :  { %845 = vmatpush3.bf16.msra.mxu0 %v881_v35 }
 0x470   :  { %846 = vmatprep.subr.bf16.mxu0 %v1039_v27 }
 0x473   :  { %847 = vmatpush3.bf16.msra.mxu0 %v882_v36 }
 0x474   :  { %848 = vmatprep.subr.bf16.mxu0 %v1039_v27 }
 0x477   :  { %849 = vmatpush3.bf16.msra.mxu0 %v883_v37 }
 0x478   :  { %850 = vmatprep.subr.bf16.mxu0 %v1039_v27 }
 0x4f1   :  { %v358_v50 = vpop.xlane.xlu1 %357 }
 0x4f2   :  { %vm362_vm6 = vcmp.eq.f32.partialorder %v354_v39, %v358_v50  ;;  %v398_v4 = vmax.f32 %v358_v50, 1e-16  ;;  %vm402_vm10 = vcmp.lt.f32.partialorder %v358_v50, 1e+30 }
 0x4f3   :  { %v364_v30 = vsel %vm362_vm6, %v1155_v29, 8 }
 0x4f4   :  { %v366_v51 = vsel %vm243_vm3, %v364_v30, 2147483647  ;;  %895 = vrcp.f32 %v398_v4 }
 0x4f5   :  { %v361_v52 = vpop.xlane.xlu0 %360  ;;  %v368_v53 = vshra.s32 %v366_v51, 16  ;;  %v367_v59 = vand.u32 65535, %v366_v51  ;;  %v884_v51 = vld [vmem:[%s1260_s11 + $0x10] sm:$0xff]  }
 0x4f6   :  { %vm363_vm7 = vcmp.eq.f32.partialorder %v355_v46, %v361_v52  ;;  %v399_v5 = vmax.f32 %v361_v52, 1e-16  ;;  %vm403_vm12 = vcmp.lt.f32.partialorder %v361_v52, 1e+30  ;;  %851 = vmatpush3.bf16.msra.mxu0 %v884_v51  ;;  %v885_v52 = vld [vmem:[%s1260_s11 + $0x8] sm:$0xff]  }
 0x4f7   :  { %v370_v54 = vcvt.s32.f32 %v368_v53  ;;  %v365_v55 = vsel %vm363_vm7, %v1155_v29, 8  ;;  %v369_v61 = vcvt.s32.f32 %v367_v59  ;;  %852 = vmatprep.subr.bf16.mxu0 %v1039_v27  ;;  %v886_v53 = vld [vmem:[%s1260_s11] sm:$0xff]   ;;  %s1041_s11 = smov [#allocation11]  }
 0x4f8   :  { %v381_v56 = vsel %vm243_vm3, %v365_v55, 2147483647  ;;  %897 = vrcp.f32 %v399_v5  ;;  %s759_s7 = sshll.u32 %s1041_s11, 4  ;;  %s760_s7 = int_to_ptr.vmem [resolvable:$true] %s759_s7 }
 0x4f9   :  { %371 = vmin.xlane.f32.xlu1 %v370_v54  ;;  %v383_v57 = vshra.s32 %v381_v56, 16  ;;  %v382_v62 = vand.u32 65535, %v381_v56  ;;  %v786_v56 = vld [vmem:[#allocation10] ss:$0 sm:$0xff]  ;;  %s1003_s22 = scalar_lea.vmem %s760_s7, 256  ;;  %p1008_p12 = scmp.lt.s32.totalorder %s760_s7, %s760_s7 }
 0x4fa   :  { %853 = vmatpush3.bf16.msra.mxu0 %v885_v52  ;;  %p1004_p11 = scmp.ne.s32.totalorder %s760_s7, %s1003_s22  ;;  %p1009_p13 = scmp.lt.s32.totalorder %s1003_s22, %s1003_s22 }
 0x4fb   :  { %v385_v58 = vcvt.s32.f32 %v383_v57  ;;  %v384_v1 = vcvt.s32.f32 %v382_v62  ;;  %854 = vmatprep.subr.bf16.mxu0 %v1039_v27 }
 0x4fc   :  { %p1010_p0 = por %p1009_p13, %p1008_p12 }
 0x4fd   :  { %386 = vmin.xlane.f32.xlu0 %v385_v58 }
 0x4fe   :  { %855 = vmatpush3.bf16.msra.mxu0 %v886_v53  ;;  %p1011_p1 = pnand %p1010_p0, %p1004_p11 }
 0x501   :  { %v896_v11 = vpop.eup %895 }
 0x502   :  { %v404_v14 = vsel %vm402_vm10, %v896_v11, 0.0 }
 0x505   :  { %v898_v17 = vpop.eup %897 }
 0x506   :  { %v405_v21 = vsel %vm403_vm12, %v898_v17, 0.0 }
 0x582   :  { %v372_v60 = vpop.xlane.xlu1 %371 }
 0x583   :  { %vm373_vm8 = vcmp.eq.f32.partialorder %v370_v54, %v372_v60  ;;  %v378_v6 = vcvt.f32.s32 %v372_v60 }
 0x584   :  { %v374_v63 = vsel %vm373_vm8, %v369_v61, inf }
 0x585   :  { %375 = vmin.xlane.f32.xlu1 %v374_v63  ;;  %v379_v8 = vshll.u32 %v378_v6, 16 }
 0x586   :  { %v387_v0 = vpop.xlane.xlu0 %386 }
 0x587   :  { %vm388_vm9 = vcmp.eq.f32.partialorder %v385_v58, %v387_v0  ;;  %v393_v9 = vcvt.f32.s32 %v387_v0 }
 0x588   :  { %v389_v2 = vsel %vm388_vm9, %v384_v1, inf }
 0x589   :  { %390 = vmin.xlane.f32.xlu0 %v389_v2  ;;  %v394_v15 = vshll.u32 %v393_v9, 16  ;;  %v787_v2 = vld [vmem:[%s1261_s12] ss:$0 sm:$0xff] }
 0x60e   :  { %v376_v7 = vpop.xlane.xlu1 %375 }
 0x60f   :  { %v377_v10 = vcvt.f32.s32 %v376_v7 }
 0x611   :  { %v380_v12 = vadd.s32 %v379_v8, %v377_v10 }
 0x612   :  { %v391_v13 = vpop.xlane.xlu0 %390 }
 0x613   :  { %vm396_vm11 = vcmp.eq.s32.totalorder %v1155_v29, %v380_v12  ;;  %v392_v16 = vcvt.f32.s32 %v391_v13 }
 0x614   :  { %v406_v18 = vsel %vm396_vm11, %v404_v14, 0.0 }
 0x615   :  { %v408_v19 = vadd.f32 %v406_v18, %v352_v42  ;;  %v395_v20 = vadd.s32 %v394_v15, %v392_v16 }
 0x617   :  { %vm397_vm13 = vcmp.eq.s32.totalorder %v1155_v29, %v395_v20  ;;  %823 = vmatprep.mubr.msk.f32.mxu1 %vm243_vm3, %v408_v19  ;;  %v492_v22 = vsel %vm243_vm3, %v408_v19, 0.0  ;;  %v876_v29 = vld [vmem:[%s1252_s3] sm:$0xff]  }
 0x618   :  { %v407_v23 = vsel %vm397_vm13, %v405_v21, 0.0  ;;  %493 = vadd.xlane.f32.xlu1 %v492_v22 }
 0x619   :  { %v409_v24 = vadd.f32 %v407_v23, %v353_v49 }
 0x61b   :  { %824 = vmatmul.mubr.msk.f32.vlgmr.msra.gmra.mxu1 %vm243_vm3, %v409_v24  ;;  %v495_v25 = vsel %vm243_vm3, %v409_v24, 0.0  ;;  %vm581_vm3 = vcmask 261120  }
 0x61c   :  { %496 = vadd.xlane.f32.xlu0 %v495_v25  ;;  %828 = vmatprep.mubr.msk.bf16.mxu1 %vm1040_vm14, %v1039_v27 }
 0x61d   :  { %827 = vmatpush3.bf16.msra.mxu1 %v875_v26 }
 0x61e   :  { %832 = vmatprep.subr.bf16.mxu1 %v1039_v27 }
 0x620   :  { %829 = vmatmul.mubr.msk.bf16.vlgmr.msra.gmra.mxu1 %vm524_vm15, %v876_v29 }
 0x621   :  { %833 = vmatpush3.bf16.msra.mxu1 %v877_v28  ;;  %836 = vmatprep.mubr.msk.bf16.mxu1 %vm1040_vm14, %v1039_v27 }
 0x622   :  { %834 = vmatprep.subr.bf16.mxu1 %v1039_v27 }
 0x625   :  { %835 = vmatpush3.bf16.msra.mxu1 %v878_v32 }
 0x6a1   :  { %v494_v38 = vpop.xlane.xlu1 %493 }
 0x6a2   :  { %v498_v40 = vmax.f32 %v494_v38, 1e-16 }
 0x6a4   :  { %899 = vrcp.f32 %v498_v40 }
 0x6a5   :  { %v497_v39 = vpop.xlane.xlu0 %496 }
 0x6a6   :  { %v499_v41 = vmax.f32 %v497_v39, 1e-16 }
 0x6a8   :  { %901 = vrcp.f32 %v499_v41 }
 0x6b1   :  { %v900_v42 = vpop.eup %899 }
 0x6b5   :  { %v902_v43 = vpop.eup %901 }
 0x6db   :  { %v825_v31 = vpop.f32.mrf.mxu1 }
 0x6dc   :  { %v503_v45 = vmul.f32 %v902_v43, %v825_v31 }
 0x6dd   :  { %v483_v44 = vpop.f32.mrf.mxu1 }
 0x6de   :  { %v502_v46 = vmul.f32 %v900_v42, %v483_v44 }
 0x6e0   :  { %v504_v47 = vpack.c.bf16 %v503_v45, %v502_v46  ;;  %v562_v48 = vpop.f32.mrf.mxu1 }
 0x6e2   :  { %837 = vmatmul.mubr.msk.bf16.vlgmr.msra.gmra.mxu1 %vm581_vm3, %v504_v47  ;;  %v830_v49 = vpop.f32.mrf.mxu1 }
 0x6e4   :  { %v565_v50 = vpop.f32.mrf.mxu1 }
 0x6e6   :  { %v831_v30 = vpop.f32.mrf.mxu1 }
 0x7a2   :  { %v619_v54 = vpop.f32.mrf.mxu1 }
 0x7a3   :  { %v620_v55 = vadd.f32 %v619_v54, %v562_v48 }
 0x7a4   :  { %v838_v57 = vpop.f32.mrf.mxu1 }
 0x7a5   :  { %v633_v59 = vadd.f32 %v786_v56, %v620_v55 }
 0x7a6   :  { %v622_v58 = vpop.f32.mrf.mxu1 }
 0x7a7   :  { %v623_v60 = vadd.f32 %v622_v58, %v565_v50  ;;  %v635_v63 = vmax.f32 %v633_v59, 0.0 }
 0x7a8   :  { %v839_v61 = vpop.f32.mrf.mxu1 }
 0x7a9   :  { %v634_v62 = vadd.f32 %v786_v56, %v623_v60 }
 0x7ab   :  { %v636_v0 = vmax.f32 %v634_v62, 0.0 }
 0x7ad   :  { %v637_v1 = vpack.c.bf16 %v636_v0, %v635_v63 }
 0x7af   :  { %857 = vmatmul.mubr.bf16.vlgmr.msra.gmra.mxu0 %v637_v1 }
 0x86f   :  { %v743_v3 = vpop.f32.mrf.mxu0 }
 0x870   :  { %v744_v4 = vadd.f32 %v787_v2, %v743_v3 }
 0x871   :  { %v858_v5 = vpop.f32.mrf.mxu0 }
 0x872   :  { %v750_v6 = vmax.f32 %v744_v4, 0.0 }
 0x873   :  { %v746_v7 = vpop.f32.mrf.mxu0 }
 0x874   :  { %752 = vst [vmem:[#allocation11] sm:$0xff] %v750_v6  ;;  %v747_v8 = vadd.f32 %v787_v2, %v746_v7 }
 0x875   :  { %v859_v9 = vpop.f32.mrf.mxu0 }
 0x876   :  { %v751_v10 = vmax.f32 %v747_v8, 0.0 }
 0x878   :  { %753 = vst [vmem:[#allocation11 + $0x8] sm:$0xff] %v751_v10 }
 0x879   :  { %1014 = shalt.err (!%p1011_p1)
}
 0x87a   :  { %s1042_s12 = smov 128   ;;  %s1043_s23 = smov 8  }
 0x87b   :  { %765 = dma.vmem_to_hbm [thread:$0]  %s760_s7, 256, %s1262_s13, [#allocation4], %s1042_s12, %s1042_s12, %s1043_s23  }
 0x87c   :  { %1029 = dma.done.wait [#allocation4], 256  }
 0x87d   :  { %1030 = vsyncadd [#allocation4], 4294967040 }
 0x87e   :  { %769 = vsyncpa [#allocation3], 1 }
 0x87f   :  { %770 = vsyncpa [#allocation6], 1 }
 0x880   :  { %771 = vsyncpa [#allocation9], 1 }
 0x881   :  { %772 = vsyncpa [#allocation4], 1 }

</bundles_post_ra>
